<compile_context>
chip_gen: v7x
topology: tpu7x:2x2x1
jax: 0.10.0
libtpu: 0.0.40
codegen_flags: <defaults>
</compile_context>

<pallas_src>
import functools

import jax
import jax.numpy as jnp
from jax import lax
from jax.experimental import pallas as pl
from jax.experimental.pallas import tpu as pltpu

_BW_EPS = 1e-12  # bandwidth clamp (degenerate / all-identical inputs)


def _ksum_terms(neg, kernel_mul, kernel_num):
    """sum_k exp(neg * kernel_mul**k) for k in [0, kernel_num).

    `neg = -l2 / bw_max` (largest bandwidth). Smaller bandwidths are reached by
    repeated squaring (VPU multiplies) when kernel_mul is an integer >= 2, so
    only ONE EUP exp is issued per Gram block. Reductions are NOT done here --
    the caller sums the merged ksum once.
    """
    m_int = int(kernel_mul)
    use_pow = (float(kernel_mul) == float(m_int)) and (m_int >= 2)

    term = jnp.exp(neg)  # single EUP exp
    ksum = term
    for i in range(1, kernel_num):
        if use_pow:
            p = term
            for _ in range(m_int - 1):  # term ** kernel_mul, VPU only
                p = p * term
            term = p
        else:
            term = jnp.exp(neg * (kernel_mul ** i))  # fallback (non-integer mul)
        ksum = ksum + term
    return ksum


def _bandwidth_inv_max(sum_sq_centered, n, kernel_mul, kernel_num):
    """1 / largest bandwidth, from centered squared norms (cancellation-free)."""
    # sum_ij ||x_i - x_j||^2 == 2 * n * sum_i ||x_i - mu||^2   (colsum of centered == 0)
    sum_l2 = 2.0 * n * sum_sq_centered
    bandwidth = sum_l2 / float(n * n - n)
    bandwidth = bandwidth / (kernel_mul ** (kernel_num // 2))
    bandwidth = jnp.maximum(bandwidth, _BW_EPS)
    return 1.0 / (bandwidth * (kernel_mul ** (kernel_num - 1)))


# A.B^T expressed directly as a contraction over dim 1 of both operands:
# no explicit transpose, the MXU consumes the transposed operand natively.
_DN_ABT = (((1,), (1,)), ((), ()))


def _mmd_kernel_fused(total_ref, loss_ref, *, batch, kernel_mul, kernel_num,
                      matmul_dtype):
    """Small-B path: one (2B,2B) Gram block + quadrant sign mask."""
    f32 = jnp.float32
    total = total_ref[...].astype(f32)                       # (2B, D)
    n = total.shape[0]

    # Center on the joint mean (distances invariant; stabilizes bandwidth & l2).
    mean = jnp.sum(total, axis=0, keepdims=True) * (1.0 / n)
    tc = total - mean                                        # (2B, D) f32
    sq = jnp.sum(tc * tc, axis=-1, keepdims=True)            # (2B, 1)
    inv_bw_max = _bandwidth_inv_max(jnp.sum(sq), n, kernel_mul, kernel_num)

    a = tc.astype(matmul_dtype)
    gram = lax.dot_general(a, a, dimension_numbers=_DN_ABT,
                           preferred_element_type=f32)       # MXU, (2B, 2B)
    sq_row = sq.T                                            # built once
    l2 = jnp.maximum(sq + sq_row - 2.0 * gram, 0.0)          # clamp cancellation
    ksum = _ksum_terms(-l2 * inv_bw_max, kernel_mul, kernel_num)

    # +1 on the XX / YY quadrants, -1 on XY / YX.
    row_tgt = lax.broadcasted_iota(jnp.int32, (n, n), 0) >= batch
    col_tgt = lax.broadcasted_iota(jnp.int32, (n, n), 1) >= batch
    sign = jnp.where(row_tgt == col_tgt, 1.0, -1.0)

    loss_ref[0, 0] = jnp.sum(sign * ksum) / float(batch * batch)


def _mmd_kernel_split(src_ref, tgt_ref, loss_ref, *, kernel_mul, kernel_num,
                      matmul_dtype):
    """Large-B path: three Gram blocks (xx, yy, xy); sum(YX) == sum(XY)."""
    f32 = jnp.float32
    src = src_ref[...].astype(f32)                           # (B, D)
    tgt = tgt_ref[...].astype(f32)                           # (B, D)
    b = src.shape[0]
    n = 2 * b

    mean = (jnp.sum(src, axis=0, keepdims=True) +
            jnp.sum(tgt, axis=0, keepdims=True)) * (1.0 / n)
    src_c = src - mean
    tgt_c = tgt - mean
    sq_s = jnp.sum(src_c * src_c, axis=-1, keepdims=True)    # (B, 1)
    sq_t = jnp.sum(tgt_c * tgt_c, axis=-1, keepdims=True)    # (B, 1)
    inv_bw_max = _bandwidth_inv_max(jnp.sum(sq_s) + jnp.sum(sq_t), n,
                                    kernel_mul, kernel_num)

    a_s = src_c.astype(matmul_dtype)
    a_t = tgt_c.astype(matmul_dtype)
    # Hoisted row-form norms: built once, shared by the three blocks.
    sq_s_row = sq_s.T
    sq_t_row = sq_t.T

    def block_sum(a, sq_col, bmat, sq_row):
        gram = lax.dot_general(a, bmat, dimension_numbers=_DN_ABT,
                               preferred_element_type=f32)   # MXU
        l2 = jnp.maximum(sq_col + sq_row - 2.0 * gram, 0.0)
        ksum = _ksum_terms(-l2 * inv_bw_max, kernel_mul, kernel_num)
        return jnp.sum(ksum)                                 # one reduction / block

    xx = block_sum(a_s, sq_s, a_s, sq_s_row)
    yy = block_sum(a_t, sq_t, a_t, sq_t_row)
    xy = block_sum(a_s, sq_s, a_t, sq_t_row)

    loss_ref[0, 0] = (xx + yy - 2.0 * xy) / float(b * b)


def _vmem_limit_bytes(est_bytes):
    """Scoped-VMEM request, capped at ~85% of physical VMEM (64 MiB on v7x)."""
    if est_bytes <= (16 << 20):
        return None
    try:
        cap = int(0.85 * pltpu.get_tpu_info().vmem_capacity_bytes)
    except Exception:  # pragma: no cover - conservative fallback
        cap = 48 << 20
    return min(2 * est_bytes, cap)


@functools.partial(jax.jit, static_argnames=("kernel_mul", "kernel_num"))
def mmd_loss(source, target, kernel_mul=2.0, kernel_num=5):
    assert source.ndim == 2 and source.shape == target.shape
    B, D = source.shape
    kernel_mul = float(kernel_mul)
    kernel_num = int(kernel_num)

    # Gram matmul dtype: bf16 for large f32 problems hits the native MXU path
    # (~4x MXU throughput); norms / l2 / exp / accumulation stay f32.
    if source.dtype == jnp.bfloat16:
        matmul_dtype = jnp.bfloat16
    elif B >= 512 and B * D >= (1 << 20):
        matmul_dtype = jnp.bfloat16  # documented small precision tradeoff
    else:
        matmul_dtype = jnp.float32

    fused = B <= 128
    n = 2 * B
    itemsize = jnp.dtype(source.dtype).itemsize

    if fused:
        gram_elems = n * n
        flops = 2 * n * n * D + 10 * gram_elems * kernel_num
        transcendentals = gram_elems
        est_bytes = 8 * n * D * 4 + 20 * gram_elems + (1 << 20)
    else:
        gram_elems = B * B
        flops = 3 * (2 * B * B * D) + 10 * 3 * gram_elems * kernel_num
        transcendentals = 3 * gram_elems
        est_bytes = 8 * B * D * 4 + 20 * gram_elems + (1 << 20)

    cost = pl.CostEstimate(
        flops=int(flops),
        transcendentals=int(transcendentals),
        bytes_accessed=int(2 * B * D * itemsize + 4),
    )

    vmem_limit = _vmem_limit_bytes(est_bytes)
    compiler_params = (pltpu.CompilerParams(vmem_limit_bytes=vmem_limit)
                       if vmem_limit is not None else None)

    vmem_spec = pl.BlockSpec(memory_space=pltpu.MemorySpace.VMEM)
    out_spec = pl.BlockSpec(memory_space=pltpu.MemorySpace.SMEM)
    out_shape = jax.ShapeDtypeStruct((1, 1), jnp.float32)

    if fused:
        # Concat once in the wrapper (tiny at B<=128): kernel sees one (2B,D)
        # slab, no in-kernel sublane concat / alignment concerns.
        total = jnp.concatenate([source, target], axis=0)
        kernel = functools.partial(
            _mmd_kernel_fused, batch=B, kernel_mul=kernel_mul,
            kernel_num=kernel_num, matmul_dtype=matmul_dtype)
        out = pl.pallas_call(
            kernel,
            out_shape=out_shape,
            in_specs=[vmem_spec],
            out_specs=out_spec,
            compiler_params=compiler_params,
            cost_estimate=cost,
        )(total)
    else:
        kernel = functools.partial(
            _mmd_kernel_split, kernel_mul=kernel_mul,
            kernel_num=kernel_num, matmul_dtype=matmul_dtype)
        out = pl.pallas_call(
            kernel,
            out_shape=out_shape,
            in_specs=[vmem_spec, vmem_spec],
            out_specs=out_spec,
            compiler_params=compiler_params,
            cost_estimate=cost,
        )(source, target)
    return out[0, 0]


def _mmd_loss_ref(source, target, kernel_mul=2.0, kernel_num=5):
    """Pure-JAX transcription of the PyTorch reference (for validation)."""
    b = source.shape[0]
    total = jnp.concatenate([source, target], axis=0)
    n = total.shape[0]
    diff = total[None, :, :] - total[:, None, :]
    l2 = jnp.sum(diff * diff, axis=2)
    bandwidth = jnp.sum(l2) / (n * n - n)
    bandwidth = bandwidth / (kernel_mul ** (kernel_num // 2))
    ksum = sum(jnp.exp(-l2 / (bandwidth * kernel_mul ** i)) for i in range(kernel_num))
    return jnp.mean(ksum[:b, :b] + ksum[b:, b:] - ksum[:b, b:] - ksum[b:, :b])


if __name__ == "__main__":
    key = jax.random.PRNGKey(0)
    k1, k2 = jax.random.split(key)

    # Small shapes -> fused single-Gram path.
    B, D = 8, 32
    source = jax.random.normal(k1, (B, D), dtype=jnp.float32)
    target = jax.random.normal(k2, (B, D), dtype=jnp.float32) + 0.5

    loss = mmd_loss(source, target)
    jax.block_until_ready(loss)
    ref = _mmd_loss_ref(source, target)
    assert jnp.allclose(loss, ref, rtol=1e-4, atol=1e-5), (loss, ref)

    # Moderate shapes -> 3-block split path (exercise it once too).
    B2, D2 = 192, 64
    s2 = jax.random.normal(jax.random.PRNGKey(1), (B2, D2), dtype=jnp.float32)
    t2 = jax.random.normal(jax.random.PRNGKey(2), (B2, D2), dtype=jnp.float32) * 0.9 + 0.3
    loss2 = mmd_loss(s2, t2)
    jax.block_until_ready(loss2)
    ref2 = _mmd_loss_ref(s2, t2)
    assert jnp.allclose(loss2, ref2, rtol=2e-3, atol=1e-4), (loss2, ref2)

    print("KERNEL_OK")
</pallas_src>

<mosaic_0001>
module attributes {stable_mosaic.version = 11 : i64} {
  func.func @_mmd_kernel_fused(%arg0: memref<16x32xf32, #tpu.memory_space<vmem>>, %arg1: memref<1x1xf32, #tpu.memory_space<smem>>) attributes {dimension_semantics = [], scalar_prefetch = 0 : i64, scratch_operands = 0 : i64, tpu.core_type = #tpu.core_type<tc>} {
    %c0 = arith.constant 0 : index
    %c0_0 = arith.constant 0 : index
    %0 = vector.load %arg0[%c0, %c0_0] : memref<16x32xf32, #tpu.memory_space<vmem>>, vector<16x32xf32>
    %cst = arith.constant dense<0.000000e+00> : vector<32xf32>
    %1 = vector.multi_reduction <add>, %0, %cst [0] : vector<16x32xf32> to vector<32xf32>
    %2 = vector.shape_cast %1 : vector<32xf32> to vector<1x32xf32>
    %cst_1 = arith.constant 6.250000e-02 : f32
    %3 = vector.broadcast %cst_1 : f32 to vector<1x32xf32>
    %4 = arith.mulf %2, %3 : vector<1x32xf32>
    %5 = vector.broadcast %4 : vector<1x32xf32> to vector<16x32xf32>
    %6 = arith.subf %0, %5 : vector<16x32xf32>
    %7 = arith.mulf %6, %6 : vector<16x32xf32>
    %cst_2 = arith.constant dense<0.000000e+00> : vector<16xf32>
    %8 = vector.multi_reduction <add>, %7, %cst_2 [1] : vector<16x32xf32> to vector<16xf32>
    %9 = vector.shape_cast %8 : vector<16xf32> to vector<16x1xf32>
    %10 = vector.shape_cast %9 : vector<16x1xf32> to vector<1x16x1xf32>
    %cst_3 = arith.constant dense<0.000000e+00> : vector<1xf32>
    %11 = vector.multi_reduction <add>, %10, %cst_3 [1, 2] : vector<1x16x1xf32> to vector<1xf32>
    %12 = vector.shape_cast %11 : vector<1xf32> to vector<1x1x1xf32>
    %13 = vector.extract %12[0, 0, 0] : f32 from vector<1x1x1xf32>
    %cst_4 = arith.constant 3.200000e+01 : f32
    %14 = arith.mulf %cst_4, %13 : f32
    %cst_5 = arith.constant 2.400000e+02 : f32
    %15 = arith.divf %14, %cst_5 : f32
    %cst_6 = arith.constant 4.000000e+00 : f32
    %16 = arith.divf %15, %cst_6 : f32
    %cst_7 = arith.constant 9.99999996E-13 : f32
    %17 = arith.maximumf %16, %cst_7 : f32
    %cst_8 = arith.constant 1.600000e+01 : f32
    %18 = arith.mulf %17, %cst_8 : f32
    %cst_9 = arith.constant 1.000000e+00 : f32
    %19 = arith.divf %cst_9, %18 : f32
    %cst_10 = arith.constant dense<0.000000e+00> : vector<16x16xf32>
    %20 = tpu.matmul %6, %6, %cst_10 {dimension_numbers = #tpu.dot_dimension_numbers<[1], [1], [0], [0], [0, 0, 1, 0], [], []>} : vector<16x32xf32>, vector<16x32xf32>, vector<16x16xf32> -> vector<16x16xf32>
    %21 = tpu.transpose %9, [1, 0] : vector<16x1xf32> -> vector<1x16xf32>
    %22 = vector.broadcast %9 : vector<16x1xf32> to vector<16x16xf32>
    %23 = vector.broadcast %21 : vector<1x16xf32> to vector<16x16xf32>
    %24 = arith.addf %22, %23 : vector<16x16xf32>
    %cst_11 = arith.constant 2.000000e+00 : f32
    %25 = vector.broadcast %cst_11 : f32 to vector<16x16xf32>
    %26 = arith.mulf %25, %20 : vector<16x16xf32>
    %27 = arith.subf %24, %26 : vector<16x16xf32>
    %cst_12 = arith.constant 0.000000e+00 : f32
    %28 = vector.broadcast %cst_12 : f32 to vector<16x16xf32>
    %29 = arith.maximumf %27, %28 : vector<16x16xf32>
    %cst_13 = arith.constant 0.000000e+00 : f32
    %30 = vector.broadcast %cst_13 : f32 to vector<16x16xf32>
    %31 = arith.subf %30, %29 : vector<16x16xf32>
    %32 = vector.broadcast %19 : f32 to vector<16x16xf32>
    %33 = arith.mulf %31, %32 : vector<16x16xf32>
    %34 = math.exp %33 : vector<16x16xf32>
    %35 = arith.mulf %34, %34 : vector<16x16xf32>
    %36 = arith.addf %34, %35 : vector<16x16xf32>
    %37 = arith.mulf %35, %35 : vector<16x16xf32>
    %38 = arith.addf %36, %37 : vector<16x16xf32>
    %39 = arith.mulf %37, %37 : vector<16x16xf32>
    %40 = arith.addf %38, %39 : vector<16x16xf32>
    %41 = arith.mulf %39, %39 : vector<16x16xf32>
    %42 = arith.addf %40, %41 : vector<16x16xf32>
    %43 = tpu.iota {dimensions = array<i32: 0>} : vector<16x16xi32>
    %c8_i32 = arith.constant 8 : i32
    %44 = vector.broadcast %c8_i32 : i32 to vector<16x16xi32>
    %45 = arith.cmpi sge, %43, %44 : vector<16x16xi32>
    %46 = tpu.iota {dimensions = array<i32: 1>} : vector<16x16xi32>
    %c8_i32_14 = arith.constant 8 : i32
    %47 = vector.broadcast %c8_i32_14 : i32 to vector<16x16xi32>
    %48 = arith.cmpi sge, %46, %47 : vector<16x16xi32>
    %49 = arith.xori %45, %48 : vector<16x16xi1>
    %cst_15 = arith.constant dense<true> : vector<16x16xi1>
    %50 = arith.xori %49, %cst_15 : vector<16x16xi1>
    %cst_16 = arith.constant 1.000000e+00 : f32
    %cst_17 = arith.constant -1.000000e+00 : f32
    %51 = vector.broadcast %cst_16 : f32 to vector<16x16xf32>
    %52 = vector.broadcast %cst_17 : f32 to vector<16x16xf32>
    %53 = arith.select %50, %51, %52 : vector<16x16xi1>, vector<16x16xf32>
    %54 = arith.mulf %53, %42 : vector<16x16xf32>
    %55 = vector.shape_cast %54 : vector<16x16xf32> to vector<1x16x16xf32>
    %cst_18 = arith.constant dense<0.000000e+00> : vector<1xf32>
    %56 = vector.multi_reduction <add>, %55, %cst_18 [1, 2] : vector<1x16x16xf32> to vector<1xf32>
    %57 = vector.shape_cast %56 : vector<1xf32> to vector<1x1x1xf32>
    %58 = vector.extract %57[0, 0, 0] : f32 from vector<1x1x1xf32>
    %cst_19 = arith.constant 6.400000e+01 : f32
    %59 = arith.divf %58, %cst_19 : f32
    %c0_20 = arith.constant 0 : index
    %c0_21 = arith.constant 0 : index
    %60 = memref.load %arg1[%c0_20, %c0_21] : memref<1x1xf32, #tpu.memory_space<smem>>
    memref.store %59, %arg1[%c0_20, %c0_21] : memref<1x1xf32, #tpu.memory_space<smem>>
    return
  }
}

</mosaic_0001>

<bundles_post_ra>
// kernel: mmd_loss.1
= control target key start
LH: loop header
LB: loop body
LE: loop exit
PB: predicated region body
PF: predicated region fallthrough
CT: control target
= control target key end

     0   :  { %vm11_vm0 = vcmask 261120   ;;  %s344_s0 = inlined_call_operand.vmem [shape: f32[16,32], index: 0, kind: input, shape index: {}]   ;;  %s345_s1 = inlined_call_operand.hbm [shape: f32[1,1], index: 1, kind: output, shape index: {}]  }
   0x1   :  { %v9_v0 = vld [vmem:[%s344_s0] sm:$0xff]  ;;  %v10_v1 = vld [vmem:[%s344_s0 + $0x8] sm:$0xff] }
   0x2   :  { %6 = vsyncpa [#allocation3], 0  ;;  %v12_v2 = vsel %vm11_vm0, %v9_v0, 0.0  ;;  %v13_v3 = vsel %vm11_vm0, %v10_v1, 0.0  ;;  %vm32_vm2 = vcmask 7168   ;;  %v170_v35 = vlaneseq  ;;  %s292_s21 = scalar_lea.hbm %s345_s1, 16 }
   0x3   :  { %v14_v4 = vadd.f32 %v13_v3, %v12_v2  ;;  %vm270_vm1 = vmpackc.low %vm11_vm0, %vm11_vm0  ;;  %s304_s13 = smov 1e-12   ;;  %vm305_vm4 = vmmov 1   ;;  %vm223_vm8 = vcmask 130048   ;;  %p293_p0 = scmp.ne.s32.totalorder %s345_s1, %s292_s21 }
   0x4   :  { %v171_v36 = vshrl.u32 %v170_v35, 7  ;;  %v213_v55 = vand.u32 127, %v170_v35  ;;  %p296_p1 = scmp.lt.u32.totalorder %s292_s21, %s345_s1 }
   0x5   :  { %v15_v5 = vrot.slane %v14_v4, 4 }
   0x6   :  { %v172_v37 = vsub.s32 0, %v171_v36  ;;  %vm214_vm3 = vcmp.ge.s32.totalorder %v213_v55, 8  ;;  %p298_p2 = pnand %p296_p1, %p293_p0 }
   0x7   :  { %v16_v6 = vadd.f32 %v15_v5, %v14_v4  ;;  %vm216_vm5 = vmxor %vm305_vm4, %vm214_vm3 }
   0x8   :  { %vm217_vm6 = vmxor %vm214_vm3, %vm305_vm4 }
   0x9   :  { %v17_v7 = vrot.slane %v16_v6, 2  ;;  %vm218_vm7 = vmxor %vm216_vm5, %vm305_vm4 }
   0xb   :  { %v18_v8 = vadd.f32 %v17_v7, %v16_v6 }
   0xd   :  { %v19_v9 = vrot.slane %v18_v8, 1 }
   0xf   :  { %v20_v10 = vadd.f32 %v19_v9, %v18_v8  ;;  %v306_v8 = vmov -1.0  }
  0x10   :  { %v219_v9 = vsel %vm217_vm6, 1.0, %v306_v8 }
  0x11   :  { %v21_v11 = vmul.f32 0.0625, %v20_v10 }
  0x13   :  { %v22_v12 = vsub.f32 %v9_v0, %v21_v11  ;;  %v23_v13 = vsub.f32 %v10_v1, %v21_v11  ;;  %v220_v11 = vsel %vm218_vm7, 1.0, %v306_v8 }
  0x15   :  { %v24_v14 = vmul.f32 %v22_v12, %v22_v12  ;;  %v25_v15 = vmul.f32 %v23_v13, %v23_v13  ;;  %v269_v16 = vpack.c.bf16 %v23_v13, %v22_v12  ;;  %266 = vmatprep.mubr.msk.f32.mxu0 %vm11_vm0, %v22_v12 }
  0x17   :  { %v26_v17 = vsel %vm11_vm0, %v24_v14, 0.0  ;;  %271 = vmatprep.subr.msk.bf16.mxu0 %vm270_vm1, %v269_v16  ;;  %v29_v18 = vsel %vm11_vm0, %v25_v15, 0.0 }
  0x18   :  { %27 = vadd.xlane.f32.xlu0 %v26_v17  ;;  %274 = vmatpush3.bf16.xpose.msk.msra.mxu0 %vm270_vm1, %v269_v16 }
  0x1c   :  { %30 = vadd.xlane.f32.xlu0 %v29_v18 }
  0x1f   :  { %267 = vmatmul.mubr.msk.f32.vlgmr.msra.gmra.mrb[0].mxu0 %vm11_vm0, %v23_v13 }
  0xa5   :  { %v28_v19 = vpop.xlane.xlu0 %27 }
  0xa6   :  { %v33_v21 = vsel %vm32_vm2, %v28_v19, 0.0 }
  0xa9   :  { %v31_v20 = vpop.xlane.xlu0 %30 }
  0xaa   :  { %v34_v22 = vsel %vm32_vm2, %v31_v20, 0.0 }
  0xab   :  { %v35_v23 = vadd.f32 %v34_v22, %v33_v21 }
  0xad   :  { %36 = vadd.xlane.f32.xlu1 %v35_v23 }
  0xe0   :  { %138 = vxpose.xlu1.b32.start [1/2] (short) (narrow) %v28_v19, 8 }
  0xe4   :  { %139 = vxpose.xlu1.b32.end [2/2] (short) (narrow) %v31_v20, 8 }
  0xf2   :  { %v268_v24 = vpop.f32.mrb[0].mxu0 }
  0xf3   :  { %v129_v25 = vpop.f32.mrb[1].mxu0  ;;  %v177_v42 = vmul.f32 2.0, %v268_v24 }
  0xf4   :  { %v176_v43 = vmul.f32 2.0, %v129_v25 }
 0x13a   :  { %v37_v26 = vpop.xlane.xlu1 %36 }
 0x13b   :  { %v38_v27 = vrot.slane %v37_v26, 4 }
 0x13d   :  { %v39_v28 = vadd.f32 %v38_v27, %v37_v26 }
 0x13f   :  { %v40_v29 = vrot.slane %v39_v28, 2 }
 0x141   :  { %v41_v30 = vadd.f32 %v40_v29, %v39_v28 }
 0x143   :  { %v42_v31 = vrot.slane %v41_v30, 1 }
 0x145   :  { %v43_v32 = vadd.f32 %v42_v31, %v41_v30 }
 0x147   :  { %275 = vpush %v43_v32 }
 0x160   :  { %v154_v38 = vpop.trf.xlu1 }
 0x161   :  { %v173_v39 = vrot.slane %v154_v38, %v172_v37 }
 0x163   :  { %v174_v40 = vadd.f32 %v173_v39, %v28_v19  ;;  %v175_v41 = vadd.f32 %v173_v39, %v31_v20 }
 0x165   :  { %v179_v44 = vsub.f32 %v175_v41, %v177_v42  ;;  %v178_v45 = vsub.f32 %v174_v40, %v176_v43 }
 0x167   :  { %v181_v46 = vmax.f32 %v179_v44, 0.0  ;;  %v180_v47 = vmax.f32 %v178_v45, 0.0 }
 0x169   :  { %v182_v48 = vsub.f32 0.0, %v180_v47  ;;  %v183_v49 = vsub.f32 0.0, %v181_v46 }
 0x178   :  { %s276_s0 = spop %275 }
 0x179   :  { %s45_s10 = smul.f32 32.0, %s276_s0 }
 0x17b   :  { %s48_s11 = smul.f32 0.004166667, %s45_s10 }
 0x17d   :  { %s51_s12 = smul.f32 0.25, %s48_s11 }
 0x17f   :  { %s52_s14 = smax.f32 %s304_s13, %s51_s12 }
 0x180   :  { %s53_s15 = smul.f32 16.0, %s52_s14 }
 0x182   :  { %v54_v33 = vstv %s53_s15 }
 0x183   :  { %286 = vrcp.f32 %v54_v33 }
 0x18d   :  { %v287_v34 = vpop.eup %286 }
 0x18e   :  { %277 = vpush %v287_v34 }
 0x1bf   :  { %s278_s16 = spop %277 }
 0x1c0   :  { %v184_v50 = vstv %s278_s16 }
 0x1c1   :  { %v185_v51 = vmul.f32 %v184_v50, %v182_v48  ;;  %v186_v52 = vmul.f32 %v184_v50, %v183_v49 }
 0x1c3   :  { %v187_v53 = vmul.f32 1.442695, %v185_v51  ;;  %v189_v54 = vmul.f32 1.442695, %v186_v52 }
 0x1c5   :  { %288 = vpow2.f32 %v187_v53 }
 0x1c6   :  { %290 = vpow2.f32 %v189_v54 }
 0x1cf   :  { %v289_v56 = vpop.eup %288 }
 0x1d0   :  { %v291_v57 = vpop.eup %290  ;;  %v191_v58 = vmul.f32 %v289_v56, %v289_v56 }
 0x1d1   :  { %v192_v59 = vmul.f32 %v291_v57, %v291_v57 }
 0x1d2   :  { %v193_v60 = vadd.f32 %v289_v56, %v191_v58  ;;  %v195_v61 = vmul.f32 %v191_v58, %v191_v58 }
 0x1d3   :  { %v194_v62 = vadd.f32 %v291_v57, %v192_v59  ;;  %v196_v63 = vmul.f32 %v192_v59, %v192_v59 }
 0x1d4   :  { %v197_v0 = vadd.f32 %v195_v61, %v193_v60  ;;  %v199_v1 = vmul.f32 %v195_v61, %v195_v61 }
 0x1d5   :  { %v198_v2 = vadd.f32 %v196_v63, %v194_v62  ;;  %v200_v3 = vmul.f32 %v196_v63, %v196_v63 }
 0x1d6   :  { %v201_v4 = vadd.f32 %v199_v1, %v197_v0  ;;  %v203_v5 = vmul.f32 %v199_v1, %v199_v1 }
 0x1d7   :  { %v202_v6 = vadd.f32 %v200_v3, %v198_v2  ;;  %v204_v7 = vmul.f32 %v200_v3, %v200_v3 }
 0x1d8   :  { %v205_v10 = vadd.f32 %v203_v5, %v201_v4 }
 0x1d9   :  { %v206_v12 = vadd.f32 %v204_v7, %v202_v6 }
 0x1da   :  { %v221_v13 = vmul.f32 %v219_v9, %v205_v10 }
 0x1db   :  { %v222_v14 = vmul.f32 %v220_v11, %v206_v12 }
 0x1dc   :  { %v224_v15 = vsel %vm223_vm8, %v221_v13, 0.0 }
 0x1dd   :  { %v225_v16 = vsel %vm223_vm8, %v222_v14, 0.0 }
 0x1de   :  { %v226_v17 = vadd.f32 %v225_v16, %v224_v15 }
 0x1e0   :  { %227 = vadd.xlane.f32.xlu0 %v226_v17 }
 0x26d   :  { %v228_v18 = vpop.xlane.xlu0 %227 }
 0x26e   :  { %v229_v19 = vrot.slane %v228_v18, 4 }
 0x270   :  { %v230_v20 = vadd.f32 %v229_v19, %v228_v18 }
 0x272   :  { %v231_v21 = vrot.slane %v230_v20, 2 }
 0x274   :  { %v232_v22 = vadd.f32 %v231_v21, %v230_v20 }
 0x276   :  { %v233_v23 = vrot.slane %v232_v22, 1 }
 0x278   :  { %v234_v24 = vadd.f32 %v233_v23, %v232_v22 }
 0x27a   :  { %279 = vpush %v234_v24 }
 0x2ab   :  { %s280_s17 = spop %279 }
 0x2ac   :  { %s238_s18 = smul.f32 0.015625, %s280_s17 }
 0x2ae   :  { %240 = sst [smem:[#allocation2]] %s238_s18 }
 0x2af   :  { %301 = shalt.err (!%p298_p2)
}
 0x2b0   :  { %s307_s26 = smov [#allocation2]  }
 0x2b1   :  { %248 = dma.smem_to_hbm %s307_s26, 16, %s345_s1, [#allocation3]  }
 0x2b2   :  { %302 = dma.done.wait [#allocation3], 16  }
 0x2b3   :  { %303 = vsyncadd [#allocation3], 4294967280 }
 0x2b4   :  { %252 = sfence }
 0x2b5   :  { %253 = vsyncpa [#allocation3], 1 }

</bundles_post_ra>
